<compile_context>
chip_gen: v7x
topology: tpu7x:2x2x1
jax: 0.10.0
libtpu: 0.0.40
codegen_flags: <defaults>
</compile_context>

<pallas_src>
import jax
import jax.numpy as jnp
from jax.experimental import pallas as pl
from jax.experimental.pallas import tpu as pltpu

# ---- hyper-parameters consistent with the PyTorch __init__ ----
VOCAB_SIZE = 100
TEXT_EMB_DIM = 32        # text_embedding_dim (E)
LOC_DIM = 8              # location_input_dim
ITEM_SEASON_DIM = 4      # item_season_input_dim
QUERY_SEASON_DIM = 4     # query_season_input_dim
NUM_CATEGORIES = 10
CAT_EMB_DIM = 16         # category_embedding_dim
CONV_FILTERS = 32        # F
DENSE_UNITS = 32
SHARED_DENSE = 64        # shared_dense_units
BATCH = 8
SEQ_LEN = 16             # L
BN_EPS = 1e-5

F = CONV_FILTERS
E = TEXT_EMB_DIM
BRANCH_IN = LOC_DIM + ITEM_SEASON_DIM + QUERY_SEASON_DIM + CAT_EMB_DIM   # 32
BRANCH_H = DENSE_UNITS * 2 + DENSE_UNITS * 3                             # 160
IM2COL_K = 5 * E                                                         # 160

# ---- row offsets inside the single packed parameter slab w_all [W_ROWS, 160] ----
R_BMASK = 0                               # [L, 128]   conv bias + (-1e30) validity mask
R_BR1 = R_BMASK + SEQ_LEN                 # [32, 160]  block-diag loc1|is1|qs1|cat1
R_FC1 = R_BR1 + BRANCH_IN                 # [320, 64]  fc1 split per source (BN folded)
R_W32 = R_FC1 + 128 + DENSE_UNITS + BRANCH_H      # 368: loc2(pad) | fc2 fold | fc3 fold
R_OUT = R_W32 + BRANCH_H + SHARED_DENSE + 32      # 624: output layer (bn3 folded), [32,128]
R_BIAS = R_OUT + 32                       # 656: 6 bias rows
W_ROWS = R_BIAS + 8                       # 664 (multiple of 8)


# ----------------------------------------------------------------------------
# Kernel
# ----------------------------------------------------------------------------
def _kernel(xc_ref, brin_ref, wconv_ref, wall_ref, out_ref):
    f32 = jnp.float32
    L = SEQ_LEN

    def leaky(z):
        return jnp.maximum(z, 0.1 * z)

    def dot(a, b):
        return jnp.dot(a, b, preferred_element_type=f32)

    # ---- text branch: all 12 conv taps in ONE im2col MXU matmul (bf16 in, f32 acc) ----
    y = dot(xc_ref[...], wconv_ref[...]).reshape(BATCH, L, 128)        # [B,L,128]
    # precomputed slab: conv bias where (s, channel) is a valid conv output, -1e30 where not
    conv = jnp.maximum(y + wall_ref[R_BMASK:R_BMASK + L, 0:128][None, :, :], 0.0)
    x_text = jnp.max(conv, axis=1)                                     # [B,128] (cols 96: are 0)

    # ---- fused branch stage 1: [loc1 | item_season1 | query_season1 | category1] ----
    br_h = leaky(dot(brin_ref[...], wall_ref[R_BR1:R_BR1 + BRANCH_IN, 0:BRANCH_H])
                 + wall_ref[R_BIAS + 0:R_BIAS + 1, 0:BRANCH_H])        # [B,160]

    # ---- location stage 2 (weight rows 64:160 are zero -> only loc block feeds it) ----
    x_loc = leaky(dot(br_h, wall_ref[R_W32:R_W32 + BRANCH_H, 0:DENSE_UNITS])
                  + wall_ref[R_BIAS + 1:R_BIAS + 2, 0:DENSE_UNITS])    # [B,32]

    # ---- fc1 as K-partitioned partial sums; branch BatchNorms folded into these weights ----
    z1 = (dot(x_text, wall_ref[R_FC1:R_FC1 + 128, 0:SHARED_DENSE])
          + dot(x_loc, wall_ref[R_FC1 + 128:R_FC1 + 160, 0:SHARED_DENSE])
          + dot(br_h, wall_ref[R_FC1 + 160:R_FC1 + 320, 0:SHARED_DENSE])
          + wall_ref[R_BIAS + 2:R_BIAS + 3, 0:SHARED_DENSE])
    h1 = leaky(z1)                                                     # [B,64]

    # ---- head (bn1/bn2/bn3 folded into fc2/fc3/output; dropout = identity in eval) ----
    h2 = leaky(dot(h1, wall_ref[R_W32 + 160:R_W32 + 224, 0:32])
               + wall_ref[R_BIAS + 3:R_BIAS + 4, 0:32])                # [B,32]
    h3 = leaky(dot(h2, wall_ref[R_W32 + 224:R_W32 + 256, 0:32])
               + wall_ref[R_BIAS + 4:R_BIAS + 5, 0:32])                # [B,32]
    out_ref[...] = (dot(h3, wall_ref[R_OUT:R_OUT + 32, 0:128])
                    + wall_ref[R_BIAS + 5:R_BIAS + 6, 0:128])          # [B,128]


# ----------------------------------------------------------------------------
# Parameter init (raw, PyTorch-like) + one-time packing / BN folding
# ----------------------------------------------------------------------------
def init_params(key):
    keys = iter(jax.random.split(key, 64))

    def nrm(shape, s=0.1):
        return jax.random.normal(next(keys), shape, jnp.float32) * s

    p = {}
    emb_text = nrm((VOCAB_SIZE, TEXT_EMB_DIM))
    p["emb_text"] = emb_text.at[0].set(0.0)               # padding_idx=0
    p["emb_cat"] = nrm((NUM_CATEGORIES, CAT_EMB_DIM))

    # Conv1d weights stored per-tap as [k, E, F]; bias as [1, F].
    for k in (3, 4, 5):
        p[f"conv{k}_w"] = nrm((k, TEXT_EMB_DIM, CONV_FILTERS))
        p[f"conv{k}_b"] = nrm((1, CONV_FILTERS), 0.05)

    def lin(name, din, dout):
        p[f"{name}_w"] = nrm((din, dout))                 # [in, out] (transposed vs torch)
        p[f"{name}_b"] = nrm((1, dout), 0.05)

    lin("loc1", LOC_DIM, DENSE_UNITS * 2)
    lin("loc2", DENSE_UNITS * 2, DENSE_UNITS)
    lin("is1", ITEM_SEASON_DIM, DENSE_UNITS)
    lin("qs1", QUERY_SEASON_DIM, DENSE_UNITS)
    lin("cat1", CAT_EMB_DIM, DENSE_UNITS)
    combined = CONV_FILTERS * 3 + DENSE_UNITS * 4         # 224
    lin("fc1", combined, SHARED_DENSE)
    lin("fc2", SHARED_DENSE, SHARED_DENSE // 2)
    lin("fc3", SHARED_DENSE // 2, SHARED_DENSE // 4)
    lin("out", SHARED_DENSE // 4, 1)

    # BatchNorm1d with non-trivial affine + running stats (so the fold is really tested).
    def bn(name, d):
        p[f"{name}_gamma"] = 1.0 + nrm((d,), 0.2)
        p[f"{name}_beta"] = nrm((d,), 0.2)
        p[f"{name}_mean"] = nrm((d,), 0.2)
        p[f"{name}_var"] = 0.5 + jax.random.uniform(next(keys), (d,), jnp.float32)

    bn("locbn", DENSE_UNITS)
    bn("isbn", DENSE_UNITS)
    bn("qsbn", DENSE_UNITS)
    bn("catbn", DENSE_UNITS)
    bn("bn1", SHARED_DENSE)
    bn("bn2", SHARED_DENSE // 2)
    bn("bn3", SHARED_DENSE // 4)
    return p


def prepare_params(p):
    """One-time packing: fold eval-mode BN exactly into the next Linear and pack
    everything into two lane-friendly slabs (bf16 conv weights + one f32 slab)."""
    f32 = jnp.float32
    hp = jax.lax.Precision.HIGHEST

    def bn_fold(name):
        s = p[f"{name}_gamma"] / jnp.sqrt(p[f"{name}_var"] + BN_EPS)
        t = p[f"{name}_beta"] - p[f"{name}_mean"] * s
        return s, t

    s_loc, t_loc = bn_fold("locbn")
    s_is, t_is = bn_fold("isbn")
    s_qs, t_qs = bn_fold("qsbn")
    s_cat, t_cat = bn_fold("catbn")
    s1, t1 = bn_fold("bn1")
    s2, t2 = bn_fold("bn2")
    s3, t3 = bn_fold("bn3")

    # ---- im2col conv slab [5*E, 128]: row group o = [c3_o | c4_o | c5_o | 0], zero rows
    #      where tap o >= k ----
    wc = jnp.zeros((IM2COL_K, 128), f32)
    for o in range(5):
        r = o * E
        if o < 3:
            wc = wc.at[r:r + E, 0:F].set(p["conv3_w"][o])
        if o < 4:
            wc = wc.at[r:r + E, F:2 * F].set(p["conv4_w"][o])
        wc = wc.at[r:r + E, 2 * F:3 * F].set(p["conv5_w"][o])

    # ---- conv bias + additive validity mask [L, 128]: valid -> bias, invalid -> -1e30 ----
    bias_row = jnp.zeros((128,), f32)
    bias_row = bias_row.at[0:F].set(p["conv3_b"][0])
    bias_row = bias_row.at[F:2 * F].set(p["conv4_b"][0])
    bias_row = bias_row.at[2 * F:3 * F].set(p["conv5_b"][0])
    s_idx = jnp.arange(SEQ_LEN)[:, None]
    c_idx = jnp.arange(128)[None, :]
    valid = (s_idx + c_idx // F) <= (SEQ_LEN - 3)        # per-conv valid output length
    bias_mask = jnp.where(valid, bias_row[None, :], jnp.float32(-1e30))   # [L, 128]

    # ---- branch stage-1 block-diagonal weight [32, 160] ----
    wbr1 = jnp.zeros((BRANCH_IN, BRANCH_H), f32)
    wbr1 = wbr1.at[0:8, 0:64].set(p["loc1_w"])
    wbr1 = wbr1.at[8:12, 64:96].set(p["is1_w"])
    wbr1 = wbr1.at[12:16, 96:128].set(p["qs1_w"])
    wbr1 = wbr1.at[16:32, 128:160].set(p["cat1_w"])

    # ---- w32 block [256, 32]: loc2 (zero-row-padded) | bn1-folded fc2 | bn2-folded fc3 ----
    w_loc2p = jnp.zeros((BRANCH_H, DENSE_UNITS), f32).at[0:64, :].set(p["loc2_w"])
    w2f = s1[:, None] * p["fc2_w"]                                       # [64, 32]
    w3f = jnp.zeros((32, 32), f32).at[:, 0:16].set(s2[:, None] * p["fc3_w"])
    w32 = jnp.concatenate([w_loc2p, w2f, w3f], axis=0)                   # [256, 32]

    # ---- w64 block [320, 64]: fc1 split per source, branch BNs folded in ----
    fc1 = p["fc1_w"]                                                     # [224, 64]
    f_text = jnp.zeros((128, SHARED_DENSE), f32).at[0:96, :].set(fc1[0:96])
    f_loc = s_loc[:, None] * fc1[96:128]
    f_branch = jnp.zeros((BRANCH_H, SHARED_DENSE), f32)
    f_branch = f_branch.at[64:96, :].set(s_is[:, None] * fc1[128:160])    # item_season
    f_branch = f_branch.at[96:128, :].set(s_qs[:, None] * fc1[192:224])   # query_season
    f_branch = f_branch.at[128:160, :].set(s_cat[:, None] * fc1[160:192])  # category
    w64 = jnp.concatenate([f_text, f_loc, f_branch], axis=0)             # [320, 64]

    # ---- output weight [32, 128], lane-dense (only column 0 used; bn3 folded in) ----
    wout = jnp.zeros((32, 128), f32).at[0:16, 0:1].set(s3[:, None] * p["out_w"])

    # ---- single consolidated parameter slab [W_ROWS, 160] ----
    w_all = jnp.zeros((W_ROWS, BRANCH_H), f32)
    w_all = w_all.at[R_BMASK:R_BMASK + SEQ_LEN, 0:128].set(bias_mask)
    w_all = w_all.at[R_BR1:R_BR1 + BRANCH_IN, 0:BRANCH_H].set(wbr1)
    w_all = w_all.at[R_FC1:R_FC1 + 320, 0:SHARED_DENSE].set(w64)
    w_all = w_all.at[R_W32:R_W32 + 256, 0:DENSE_UNITS].set(w32)
    w_all = w_all.at[R_OUT:R_OUT + 32, 0:128].set(wout)
    # bias rows (BN shifts folded via t @ W of the next layer)
    w_all = w_all.at[R_BIAS + 0, 0:64].set(p["loc1_b"][0])
    w_all = w_all.at[R_BIAS + 0, 64:96].set(p["is1_b"][0])
    w_all = w_all.at[R_BIAS + 0, 96:128].set(p["qs1_b"][0])
    w_all = w_all.at[R_BIAS + 0, 128:160].set(p["cat1_b"][0])
    w_all = w_all.at[R_BIAS + 1, 0:32].set(p["loc2_b"][0])
    b1f = (p["fc1_b"][0]
           + jnp.dot(t_loc, fc1[96:128], precision=hp)
           + jnp.dot(t_is, fc1[128:160], precision=hp)
           + jnp.dot(t_cat, fc1[160:192], precision=hp)
           + jnp.dot(t_qs, fc1[192:224], precision=hp))
    w_all = w_all.at[R_BIAS + 2, 0:64].set(b1f)
    w_all = w_all.at[R_BIAS + 3, 0:32].set(p["fc2_b"][0] + jnp.dot(t1, p["fc2_w"], precision=hp))
    w_all = w_all.at[R_BIAS + 4, 0:16].set(p["fc3_b"][0] + jnp.dot(t2, p["fc3_w"], precision=hp))
    w_all = w_all.at[R_BIAS + 5, 0:1].set(p["out_b"][0] + jnp.dot(t3, p["out_w"], precision=hp))

    return {"emb_text": p["emb_text"], "emb_cat": p["emb_cat"],
            "w_conv": wc.astype(jnp.bfloat16), "w_all": w_all}


# ----------------------------------------------------------------------------
# Forward wrapper
# ----------------------------------------------------------------------------
def forward(packed, text, location, item_season, category, query_season):
    # Glue (fused by XLA under jit): embedding gathers + im2col LHS construction.
    x_emb = jnp.take(packed["emb_text"], text, axis=0).astype(jnp.float32)    # [B,L,E]
    x_pad = jnp.pad(x_emb, ((0, 0), (0, 4), (0, 0)))                          # [B,L+4,E]
    x_conv = jnp.concatenate([x_pad[:, o:o + SEQ_LEN, :] for o in range(5)], axis=2)
    x_conv = x_conv.reshape(BATCH * SEQ_LEN, IM2COL_K).astype(jnp.bfloat16)   # [B*L,5E]

    cat_emb = jnp.take(packed["emb_cat"], category, axis=0).astype(jnp.float32)
    branch_in = jnp.concatenate(
        [location, item_season, query_season, cat_emb], axis=1).astype(jnp.float32)

    args = (x_conv, branch_in, packed["w_conv"], packed["w_all"])
    vmem = pl.BlockSpec(memory_space=pltpu.MemorySpace.VMEM)
    out = pl.pallas_call(
        _kernel,
        out_shape=jax.ShapeDtypeStruct((BATCH, 128), jnp.float32),
        in_specs=[vmem] * len(args),
        out_specs=vmem,
    )(*args)
    return out[:, :1]                                                          # [B,1]


# ----------------------------------------------------------------------------
# Pure-JAX reference replicating the PyTorch forward (eval mode, high precision)
# ----------------------------------------------------------------------------
def reference(params, text, location, item_season, category, query_season):
    hp = jax.lax.Precision.HIGHEST
    leaky = lambda x: jnp.where(x > 0, x, 0.1 * x)
    x_emb = jnp.take(params["emb_text"], text, axis=0)

    def conv(k):
        w, b = params[f"conv{k}_w"], params[f"conv{k}_b"]
        Lo = SEQ_LEN - k + 1
        acc = jnp.zeros((BATCH, Lo, CONV_FILTERS), jnp.float32)
        for o in range(k):
            acc = acc + jnp.einsum("ble,ef->blf", x_emb[:, o:o + Lo, :], w[o],
                                   precision=hp)
        return jnp.max(jax.nn.relu(acc + b), axis=1)

    x_text = jnp.concatenate([conv(3), conv(4), conv(5)], axis=1)

    def dense(x, name):
        return jnp.dot(x, params[f"{name}_w"], precision=hp) + params[f"{name}_b"]

    def bn(x, name):
        s = params[f"{name}_gamma"] / jnp.sqrt(params[f"{name}_var"] + BN_EPS)
        t = params[f"{name}_beta"] - params[f"{name}_mean"] * s
        return x * s + t

    x_loc = bn(leaky(dense(leaky(dense(location, "loc1")), "loc2")), "locbn")
    x_is = bn(leaky(dense(item_season, "is1")), "isbn")
    x_qs = bn(leaky(dense(query_season, "qs1")), "qsbn")
    cat_emb = jnp.take(params["emb_cat"], category, axis=0)
    x_cat = bn(leaky(dense(cat_emb, "cat1")), "catbn")

    x = jnp.concatenate([x_text, x_loc, x_is, x_cat, x_qs], axis=1)
    x = bn(leaky(dense(x, "fc1")), "bn1")
    x = bn(leaky(dense(x, "fc2")), "bn2")
    x = bn(leaky(dense(x, "fc3")), "bn3")
    return dense(x, "out")


if __name__ == "__main__":
    root = jax.random.PRNGKey(0)
    kp, k1, k2, k3, k4, k5 = jax.random.split(root, 6)

    params = init_params(kp)
    packed = prepare_params(params)        # one-time weight packing / BN folding

    text = jax.random.randint(k1, (BATCH, SEQ_LEN), 0, VOCAB_SIZE, dtype=jnp.int32)
    location = jax.random.normal(k2, (BATCH, LOC_DIM), jnp.float32)
    item_season = jax.random.normal(k3, (BATCH, ITEM_SEASON_DIM), jnp.float32)
    category = jax.random.randint(k4, (BATCH,), 0, NUM_CATEGORIES, dtype=jnp.int32)
    query_season = jax.random.normal(k5, (BATCH, QUERY_SEASON_DIM), jnp.float32)

    fwd = jax.jit(forward)
    out = jax.block_until_ready(fwd(packed, text, location, item_season,
                                    category, query_season))
    assert out.shape == (BATCH, 1), out.shape

    ref = reference(params, text, location, item_season, category, query_season)
    max_diff = float(jnp.max(jnp.abs(out - ref)))
    assert max_diff < 5e-3, f"max |pallas - ref| = {max_diff}"

    print("KERNEL_OK")
</pallas_src>

<mosaic_0001>
module attributes {stable_mosaic.version = 11 : i64} {
  func.func @_kernel(%arg0: memref<128x160xbf16, #tpu.memory_space<vmem>>, %arg1: memref<8x32xf32, #tpu.memory_space<vmem>>, %arg2: memref<160x128xbf16, #tpu.memory_space<vmem>>, %arg3: memref<664x160xf32, #tpu.memory_space<vmem>>, %arg4: memref<8x128xf32, #tpu.memory_space<vmem>>) attributes {dimension_semantics = [], scalar_prefetch = 0 : i64, scratch_operands = 0 : i64, tpu.core_type = #tpu.core_type<tc>} {
    %c0 = arith.constant 0 : index
    %c0_0 = arith.constant 0 : index
    %0 = vector.load %arg0[%c0, %c0_0] : memref<128x160xbf16, #tpu.memory_space<vmem>>, vector<128x160xbf16>
    %c0_1 = arith.constant 0 : index
    %c0_2 = arith.constant 0 : index
    %1 = vector.load %arg2[%c0_1, %c0_2] : memref<160x128xbf16, #tpu.memory_space<vmem>>, vector<160x128xbf16>
    %cst = arith.constant dense<0.000000e+00> : vector<128x128xf32>
    %2 = tpu.matmul %0, %1, %cst {dimension_numbers = #tpu.dot_dimension_numbers<[1], [0], [0], [1], [0, 0, 1, 1], [], []>} : vector<128x160xbf16>, vector<160x128xbf16>, vector<128x128xf32> -> vector<128x128xf32>
    %3 = vector.shape_cast %2 : vector<128x128xf32> to vector<8x16x128xf32>
    %c0_3 = arith.constant 0 : index
    %c0_4 = arith.constant 0 : index
    %4 = vector.load %arg3[%c0_3, %c0_4] : memref<664x160xf32, #tpu.memory_space<vmem>>, vector<16x128xf32>
    %5 = vector.shape_cast %4 : vector<16x128xf32> to vector<1x16x128xf32>
    %6 = vector.broadcast %5 : vector<1x16x128xf32> to vector<8x16x128xf32>
    %7 = arith.addf %3, %6 : vector<8x16x128xf32>
    %cst_5 = arith.constant 0.000000e+00 : f32
    %8 = vector.broadcast %cst_5 : f32 to vector<8x16x128xf32>
    %9 = arith.maximumf %7, %8 : vector<8x16x128xf32>
    %cst_6 = arith.constant dense<0xFF800000> : vector<8x128xf32>
    %10 = vector.multi_reduction <maximumf>, %9, %cst_6 [1] : vector<8x16x128xf32> to vector<8x128xf32>
    %c0_7 = arith.constant 0 : index
    %c0_8 = arith.constant 0 : index
    %11 = vector.load %arg1[%c0_7, %c0_8] : memref<8x32xf32, #tpu.memory_space<vmem>>, vector<8x32xf32>
    %c16 = arith.constant 16 : index
    %c0_9 = arith.constant 0 : index
    %12 = vector.load %arg3[%c16, %c0_9] : memref<664x160xf32, #tpu.memory_space<vmem>>, vector<32x160xf32>
    %cst_10 = arith.constant dense<0.000000e+00> : vector<8x160xf32>
    %13 = tpu.matmul %11, %12, %cst_10 {dimension_numbers = #tpu.dot_dimension_numbers<[1], [0], [0], [1], [0, 0, 1, 1], [], []>} : vector<8x32xf32>, vector<32x160xf32>, vector<8x160xf32> -> vector<8x160xf32>
    %c656 = arith.constant 656 : index
    %c0_11 = arith.constant 0 : index
    %14 = vector.load %arg3[%c656, %c0_11] : memref<664x160xf32, #tpu.memory_space<vmem>>, vector<1x160xf32>
    %15 = vector.broadcast %14 : vector<1x160xf32> to vector<8x160xf32>
    %16 = arith.addf %13, %15 : vector<8x160xf32>
    %cst_12 = arith.constant 1.000000e-01 : f32
    %17 = vector.broadcast %cst_12 : f32 to vector<8x160xf32>
    %18 = arith.mulf %17, %16 : vector<8x160xf32>
    %19 = arith.maximumf %16, %18 : vector<8x160xf32>
    %c368 = arith.constant 368 : index
    %c0_13 = arith.constant 0 : index
    %20 = vector.load %arg3[%c368, %c0_13] : memref<664x160xf32, #tpu.memory_space<vmem>>, vector<160x32xf32>
    %cst_14 = arith.constant dense<0.000000e+00> : vector<8x32xf32>
    %21 = tpu.matmul %19, %20, %cst_14 {dimension_numbers = #tpu.dot_dimension_numbers<[1], [0], [0], [1], [0, 0, 1, 1], [], []>} : vector<8x160xf32>, vector<160x32xf32>, vector<8x32xf32> -> vector<8x32xf32>
    %c657 = arith.constant 657 : index
    %c0_15 = arith.constant 0 : index
    %22 = vector.load %arg3[%c657, %c0_15] : memref<664x160xf32, #tpu.memory_space<vmem>>, vector<1x32xf32>
    %23 = vector.broadcast %22 : vector<1x32xf32> to vector<8x32xf32>
    %24 = arith.addf %21, %23 : vector<8x32xf32>
    %cst_16 = arith.constant 1.000000e-01 : f32
    %25 = vector.broadcast %cst_16 : f32 to vector<8x32xf32>
    %26 = arith.mulf %25, %24 : vector<8x32xf32>
    %27 = arith.maximumf %24, %26 : vector<8x32xf32>
    %c48 = arith.constant 48 : index
    %c0_17 = arith.constant 0 : index
    %28 = vector.load %arg3[%c48, %c0_17] : memref<664x160xf32, #tpu.memory_space<vmem>>, vector<128x64xf32>
    %cst_18 = arith.constant dense<0.000000e+00> : vector<8x64xf32>
    %29 = tpu.matmul %10, %28, %cst_18 {dimension_numbers = #tpu.dot_dimension_numbers<[1], [0], [0], [1], [0, 0, 1, 1], [], []>} : vector<8x128xf32>, vector<128x64xf32>, vector<8x64xf32> -> vector<8x64xf32>
    %c176 = arith.constant 176 : index
    %c0_19 = arith.constant 0 : index
    %30 = vector.load %arg3[%c176, %c0_19] : memref<664x160xf32, #tpu.memory_space<vmem>>, vector<32x64xf32>
    %cst_20 = arith.constant dense<0.000000e+00> : vector<8x64xf32>
    %31 = tpu.matmul %27, %30, %cst_20 {dimension_numbers = #tpu.dot_dimension_numbers<[1], [0], [0], [1], [0, 0, 1, 1], [], []>} : vector<8x32xf32>, vector<32x64xf32>, vector<8x64xf32> -> vector<8x64xf32>
    %32 = arith.addf %29, %31 : vector<8x64xf32>
    %c208 = arith.constant 208 : index
    %c0_21 = arith.constant 0 : index
    %33 = vector.load %arg3[%c208, %c0_21] : memref<664x160xf32, #tpu.memory_space<vmem>>, vector<160x64xf32>
    %cst_22 = arith.constant dense<0.000000e+00> : vector<8x64xf32>
    %34 = tpu.matmul %19, %33, %cst_22 {dimension_numbers = #tpu.dot_dimension_numbers<[1], [0], [0], [1], [0, 0, 1, 1], [], []>} : vector<8x160xf32>, vector<160x64xf32>, vector<8x64xf32> -> vector<8x64xf32>
    %35 = arith.addf %32, %34 : vector<8x64xf32>
    %c658 = arith.constant 658 : index
    %c0_23 = arith.constant 0 : index
    %36 = vector.load %arg3[%c658, %c0_23] : memref<664x160xf32, #tpu.memory_space<vmem>>, vector<1x64xf32>
    %37 = vector.broadcast %36 : vector<1x64xf32> to vector<8x64xf32>
    %38 = arith.addf %35, %37 : vector<8x64xf32>
    %cst_24 = arith.constant 1.000000e-01 : f32
    %39 = vector.broadcast %cst_24 : f32 to vector<8x64xf32>
    %40 = arith.mulf %39, %38 : vector<8x64xf32>
    %41 = arith.maximumf %38, %40 : vector<8x64xf32>
    %c528 = arith.constant 528 : index
    %c0_25 = arith.constant 0 : index
    %42 = vector.load %arg3[%c528, %c0_25] : memref<664x160xf32, #tpu.memory_space<vmem>>, vector<64x32xf32>
    %cst_26 = arith.constant dense<0.000000e+00> : vector<8x32xf32>
    %43 = tpu.matmul %41, %42, %cst_26 {dimension_numbers = #tpu.dot_dimension_numbers<[1], [0], [0], [1], [0, 0, 1, 1], [], []>} : vector<8x64xf32>, vector<64x32xf32>, vector<8x32xf32> -> vector<8x32xf32>
    %c659 = arith.constant 659 : index
    %c0_27 = arith.constant 0 : index
    %44 = vector.load %arg3[%c659, %c0_27] : memref<664x160xf32, #tpu.memory_space<vmem>>, vector<1x32xf32>
    %45 = vector.broadcast %44 : vector<1x32xf32> to vector<8x32xf32>
    %46 = arith.addf %43, %45 : vector<8x32xf32>
    %cst_28 = arith.constant 1.000000e-01 : f32
    %47 = vector.broadcast %cst_28 : f32 to vector<8x32xf32>
    %48 = arith.mulf %47, %46 : vector<8x32xf32>
    %49 = arith.maximumf %46, %48 : vector<8x32xf32>
    %c592 = arith.constant 592 : index
    %c0_29 = arith.constant 0 : index
    %50 = vector.load %arg3[%c592, %c0_29] : memref<664x160xf32, #tpu.memory_space<vmem>>, vector<32x32xf32>
    %cst_30 = arith.constant dense<0.000000e+00> : vector<8x32xf32>
    %51 = tpu.matmul %49, %50, %cst_30 {dimension_numbers = #tpu.dot_dimension_numbers<[1], [0], [0], [1], [0, 0, 1, 1], [], []>} : vector<8x32xf32>, vector<32x32xf32>, vector<8x32xf32> -> vector<8x32xf32>
    %c660 = arith.constant 660 : index
    %c0_31 = arith.constant 0 : index
    %52 = vector.load %arg3[%c660, %c0_31] : memref<664x160xf32, #tpu.memory_space<vmem>>, vector<1x32xf32>
    %53 = vector.broadcast %52 : vector<1x32xf32> to vector<8x32xf32>
    %54 = arith.addf %51, %53 : vector<8x32xf32>
    %cst_32 = arith.constant 1.000000e-01 : f32
    %55 = vector.broadcast %cst_32 : f32 to vector<8x32xf32>
    %56 = arith.mulf %55, %54 : vector<8x32xf32>
    %57 = arith.maximumf %54, %56 : vector<8x32xf32>
    %c624 = arith.constant 624 : index
    %c0_33 = arith.constant 0 : index
    %58 = vector.load %arg3[%c624, %c0_33] : memref<664x160xf32, #tpu.memory_space<vmem>>, vector<32x128xf32>
    %cst_34 = arith.constant dense<0.000000e+00> : vector<8x128xf32>
    %59 = tpu.matmul %57, %58, %cst_34 {dimension_numbers = #tpu.dot_dimension_numbers<[1], [0], [0], [1], [0, 0, 1, 1], [], []>} : vector<8x32xf32>, vector<32x128xf32>, vector<8x128xf32> -> vector<8x128xf32>
    %c661 = arith.constant 661 : index
    %c0_35 = arith.constant 0 : index
    %60 = vector.load %arg3[%c661, %c0_35] : memref<664x160xf32, #tpu.memory_space<vmem>>, vector<1x128xf32>
    %61 = vector.broadcast %60 : vector<1x128xf32> to vector<8x128xf32>
    %62 = arith.addf %59, %61 : vector<8x128xf32>
    %c0_36 = arith.constant 0 : index
    %c0_37 = arith.constant 0 : index
    %63 = vector.load %arg4[%c0_36, %c0_37] : memref<8x128xf32, #tpu.memory_space<vmem>>, vector<8x128xf32>
    tpu.vector_store %arg4[%c0_36, %c0_37], %62 {strides = array<i32>} : memref<8x128xf32, #tpu.memory_space<vmem>>, vector<8x128xf32>,
    return
  }
}

</mosaic_0001>

<bundles_post_ra>
// kernel: forward.1
= control target key start
LH: loop header
LB: loop body
LE: loop exit
PB: predicated region body
PF: predicated region fallthrough
CT: control target
= control target key end

     0   :  { %v1453_v3 = vmov 0.0   ;;  %v1454_v4 = vmov 0   ;;  %vm186_vm0 = vcmask 261120   ;;  %v1455_v18 = vmov 0.0|0.0   ;;  %s1938_s3 = inlined_call_operand.vmem [shape: f32[664,160], index: 3, kind: input, shape index: {}]   ;;  %s1939_s2 = inlined_call_operand.vmem [shape: bf16[160,128], index: 2, kind: input, shape index: {}]   ;;  %s1940_s1 = inlined_call_operand.vmem [shape: f32[8,32], index: 1, kind: input, shape index: {}]   ;;  %s1941_s0 = inlined_call_operand.vmem [shape: bf16[128,160], index: 0, kind: input, shape index: {}]   ;;  %s1942_s4 = inlined_call_operand.vmem [shape: f32[8,128], index: 4, kind: output, shape index: {}]  }
   0x1   :  { %v400_v0 = vld [vmem:[%s1938_s3 + $0x28] sm:$0xff]  ;;  %v402_v1 = vld [vmem:[%s1938_s3 + $0x38] sm:$0xff]  ;;  %v399_v2 = vld [vmem:[%s1938_s3 + $0x20] sm:$0xff]  ;;  %487 = vmatprep.mubr.f32.mxu1 %v1453_v3  ;;  %211 = vmatprep.subr.bf16.mxu0 %v1454_v4  ;;  %vm695_vm1 = vcmask 1041409   ;;  %vm697_vm2 = vcmask 1042434   ;;  %vm699_vm3 = vcmask 1043459  }
   0x2   :  { %v1293_v5 = vpack.c.bf16 %v402_v1, %v400_v0  ;;  %v401_v6 = vld [vmem:[%s1938_s3 + $0x30] sm:$0xff]  ;;  %v404_v7 = vld [vmem:[%s1938_s3 + $0x48] sm:$0xff]  ;;  %v406_v8 = vld [vmem:[%s1938_s3 + $0x58] sm:$0xff]  ;;  %vm701_vm4 = vcmask 1044484   ;;  %vm703_vm5 = vcmask 1045509   ;;  %vm1456_vm6 = vmmov 0  }
   0x3   :  { %v1295_v9 = vpack.c.bf16 %v401_v6, %v399_v2  ;;  %v1297_v10 = vpack.c.bf16 %v406_v8, %v404_v7  ;;  %v403_v11 = vld [vmem:[%s1938_s3 + $0x40] sm:$0xff]  ;;  %v405_v12 = vld [vmem:[%s1938_s3 + $0x50] sm:$0xff]  ;;  %v1420_v15 = vld [vmem:[%s1939_s2 + $0x8] sm:$0xff]   ;;  %vm705_vm7 = vcmask 1046534   ;;  %vm707_vm8 = vcmask 1047559  }
   0x4   :  { %1294 = vmatprep.subr.bf16.mxu1 %v1293_v5  ;;  %v1419_v13 = vld [vmem:[%s1939_s2] sm:$0xff]   ;;  %v1299_v14 = vpack.c.bf16 %v405_v12, %v403_v11  ;;  %v1421_v17 = vld [vmem:[%s1939_s2 + $0x10] sm:$0xff]   ;;  %v1422_v19 = vld [vmem:[%s1939_s2 + $0x18] sm:$0xff]   ;;  %vm884_vm9 = vcmask 523264  }
   0x5   :  { %1296 = vmatpush1.bf16.msra.mxu1 %v1295_v9  ;;  %212 = vmatpush1.bf16.msra.mxu0 %v1419_v13  ;;  %v398_v16 = vld [vmem:[%s1940_s1] sm:$0xff]  ;;  %v1424_v22 = vld [vmem:[%s1939_s2 + $0x28] sm:$0xff]   ;;  %v499_v24 = vld [vmem:[%s1938_s3 + $0x2f0] sm:$0xff] }
   0x6   :  { %1298 = vmatprep.subr.bf16.mxu1 %v1297_v10  ;;  %213 = vmatprep.subr.bf16.mxu0 %v1454_v4  ;;  %v1431_v20 = vld [vmem:[%s1941_s0 + $0x4] ss:$8 sps:$4 sm:$0xff]   ;;  %v1425_v25 = vld [vmem:[%s1939_s2 + $0x30] sm:$0xff]   ;;  %v1426_v32 = vld [vmem:[%s1939_s2 + $0x38] sm:$0xff]  }
   0x7   :  { %1149 = vmatprep.mubr.msk.bf16.mxu0 %vm186_vm0, %v1431_v20  ;;  %v1423_v21 = vld [vmem:[%s1939_s2 + $0x20] sm:$0xff]   ;;  %v501_v28 = vld [vmem:[%s1938_s3 + $0x310] sm:$0xff]  ;;  %v1428_v40 = vld [vmem:[%s1939_s2 + $0x48] sm:$0xff]  }
   0x8   :  { %v498_v23 = vld [vmem:[%s1938_s3 + $0x2e0] sm:$0xff]  ;;  %v503_v31 = vld [vmem:[%s1938_s3 + $0x330] sm:$0xff] }
   0x9   :  { %1300 = vmatpush1.bf16.msra.mxu1 %v1299_v14  ;;  %214 = vmatpush1.bf16.msra.mxu0 %v1420_v15  ;;  %v1302_v26 = vpack.c.bf16 %v499_v24, %v498_v23  ;;  %v500_v27 = vld [vmem:[%s1938_s3 + $0x300] sm:$0xff]  ;;  %v505_v35 = vld [vmem:[%s1938_s3 + $0x350] sm:$0xff] }
   0xa   :  { %1301 = vmatprep.subr.bf16.mxu1 %v1455_v18  ;;  %215 = vmatprep.subr.bf16.mxu0 %v1454_v4  ;;  %v1305_v29 = vpack.c.bf16 %v501_v28, %v500_v27  ;;  %v502_v30 = vld [vmem:[%s1938_s3 + $0x320] sm:$0xff]  ;;  %v507_v39 = vld [vmem:[%s1938_s3 + $0x370] sm:$0xff] }
   0xb   :  { %v1308_v33 = vpack.c.bf16 %v503_v31, %v502_v30  ;;  %v504_v34 = vld [vmem:[%s1938_s3 + $0x340] sm:$0xff]  ;;  %v781_v42 = vld [vmem:[%s1938_s3 + $0x1b0] sm:$0xff] }
   0xc   :  { %1158 = vmatmul.mubr.msk.f32.vlgmr.msra.gmra.mrb[0].mxu1 %vm186_vm0, %v398_v16  ;;  %v1427_v36 = vld [vmem:[%s1939_s2 + $0x40] sm:$0xff]   ;;  %v1311_v37 = vpack.c.bf16 %v505_v35, %v504_v34  ;;  %v509_v46 = vld [vmem:[%s1938_s3 + $0x390] sm:$0xff] }
   0xd   :  { %216 = vmatpush1.bf16.msra.mxu0 %v1421_v17  ;;  %1303 = vmatpush1.bf16.msra.mxu1 %v1302_v26  ;;  %v506_v38 = vld [vmem:[%s1938_s3 + $0x360] sm:$0xff]  ;;  %v1432_v47 = vld [vmem:[%s1941_s0 + $0x14] ss:$8 sps:$4 sm:$0xff]   ;;  %v1434_v58 = vld [vmem:[%s1941_s0 + $0x10] ss:$8 sps:$4 sm:$0xff]  }
   0xe   :  { %217 = vmatprep.subr.bf16.mxu0 %v1454_v4  ;;  %1304 = vmatprep.subr.bf16.mxu1 %v1455_v18  ;;  %v780_v41 = vld [vmem:[%s1938_s3 + $0x1a0] sm:$0xff]  ;;  %v1314_v43 = vpack.c.bf16 %v507_v39, %v506_v38  ;;  %v783_v50 = vld [vmem:[%s1938_s3 + $0x1d0] sm:$0xff] }
   0xf   :  { %v1429_v44 = vld [vmem:[%s1941_s0] ss:$8 sps:$4 sm:$0xff]   ;;  %v1362_v48 = vpack.c.bf16 %v781_v42, %v780_v41  ;;  %v511_v53 = vld [vmem:[%s1938_s3 + $0x3b0] sm:$0xff]  ;;  %v1435_v61 = vld [vmem:[%s1941_s0 + $0x24] ss:$8 sps:$4 sm:$0xff]  }
  0x10   :  { %v508_v45 = vld [vmem:[%s1938_s3 + $0x380] sm:$0xff]  ;;  %v785_v56 = vld [vmem:[%s1938_s3 + $0x1f0] sm:$0xff] }
  0x11   :  { %218 = vmatpush1.bf16.msra.mxu0 %v1422_v19  ;;  %1306 = vmatpush1.bf16.msra.mxu1 %v1305_v29  ;;  %v782_v49 = vld [vmem:[%s1938_s3 + $0x1c0] sm:$0xff]  ;;  %v1317_v51 = vpack.c.bf16 %v509_v46, %v508_v45  ;;  %v513_v60 = vld [vmem:[%s1938_s3 + $0x3d0] sm:$0xff] }
  0x12   :  { %219 = vmatprep.subr.bf16.mxu0 %v1454_v4  ;;  %1307 = vmatprep.subr.bf16.mxu1 %v1455_v18  ;;  %v510_v52 = vld [vmem:[%s1938_s3 + $0x3a0] sm:$0xff]  ;;  %v1365_v54 = vpack.c.bf16 %v783_v50, %v782_v49  ;;  %v787_v0 = vld [vmem:[%s1938_s3 + $0x210] sm:$0xff] }
  0x13   :  { %v784_v55 = vld [vmem:[%s1938_s3 + $0x1e0] sm:$0xff]  ;;  %v1320_v57 = vpack.c.bf16 %v511_v53, %v510_v52  ;;  %v789_v5 = vld [vmem:[%s1938_s3 + $0x230] sm:$0xff] }
  0x14   :  { %v512_v59 = vld [vmem:[%s1938_s3 + $0x3c0] sm:$0xff]  ;;  %v1368_v62 = vpack.c.bf16 %v785_v56, %v784_v55  ;;  %v1438_v7 = vld [vmem:[%s1941_s0 + $0x34] ss:$8 sps:$4 sm:$0xff]   ;;  %v1440_v14 = vld [vmem:[%s1941_s0 + $0x30] ss:$8 sps:$4 sm:$0xff]  }
  0x15   :  { %220 = vmatpush1.bf16.msra.mxu0 %v1423_v21  ;;  %1309 = vmatpush1.bf16.msra.mxu1 %v1308_v33  ;;  %v786_v63 = vld [vmem:[%s1938_s3 + $0x200] sm:$0xff]  ;;  %v1323_v1 = vpack.c.bf16 %v513_v60, %v512_v59  ;;  %v791_v10 = vld [vmem:[%s1938_s3 + $0x250] sm:$0xff] }
  0x16   :  { %221 = vmatprep.subr.bf16.mxu0 %v1454_v4  ;;  %1310 = vmatprep.subr.bf16.mxu1 %v1455_v18  ;;  %v1371_v2 = vpack.c.bf16 %v787_v0, %v786_v63  ;;  %v1437_v6 = vld [vmem:[%s1941_s0 + $0x20] ss:$8 sps:$4 sm:$0xff]   ;;  %v793_v13 = vld [vmem:[%s1938_s3 + $0x270] sm:$0xff]  ;;  %v1441_v15 = vld [vmem:[%s1941_s0 + $0x44] ss:$8 sps:$4 sm:$0xff]  }
  0x17   :  { %v790_v9 = vld [vmem:[%s1938_s3 + $0x240] sm:$0xff]  ;;  %v795_v19 = vld [vmem:[%s1938_s3 + $0x290] sm:$0xff] }
  0x18   :  { %v1377_v11 = vpack.c.bf16 %v791_v10, %v790_v9  ;;  %v792_v12 = vld [vmem:[%s1938_s3 + $0x260] sm:$0xff]  ;;  %v1446_v23 = vld [vmem:[%s1941_s0 + $0x50] ss:$8 sps:$4 sm:$0xff]   ;;  %v1450_v26 = vld [vmem:[%s1941_s0 + $0x74] ss:$8 sps:$4 sm:$0xff]  }
  0x19   :  { %222 = vmatpush1.bf16.msra.mxu0 %v1424_v22  ;;  %1312 = vmatpush1.bf16.msra.mxu1 %v1311_v37  ;;  %v1380_v16 = vpack.c.bf16 %v793_v13, %v792_v12  ;;  %v794_v17 = vld [vmem:[%s1938_s3 + $0x280] sm:$0xff]  ;;  %v1444_v22 = vld [vmem:[%s1941_s0 + $0x54] ss:$8 sps:$4 sm:$0xff]   ;;  %v1452_v33 = vld [vmem:[%s1941_s0 + $0x70] ss:$8 sps:$4 sm:$0xff]  }
  0x1a   :  { %223 = vmatprep.subr.bf16.mxu0 %v1454_v4  ;;  %1313 = vmatprep.subr.bf16.mxu1 %v1455_v18  ;;  %v1383_v20 = vpack.c.bf16 %v795_v19, %v794_v17  ;;  %v1443_v21 = vld [vmem:[%s1941_s0 + $0x40] ss:$8 sps:$4 sm:$0xff]   ;;  %v1447_v24 = vld [vmem:[%s1941_s0 + $0x64] ss:$8 sps:$4 sm:$0xff]   ;;  %v515_v28 = vld [vmem:[%s1938_s3 + $0x3f0] sm:$0xff] }
  0x1b   :  { %v514_v27 = vld [vmem:[%s1938_s3 + $0x3e0] sm:$0xff]  ;;  %v797_v31 = vld [vmem:[%s1938_s3 + $0x2b0] sm:$0xff] }
  0x1c   :  { %v796_v29 = vld [vmem:[%s1938_s3 + $0x2a0] sm:$0xff]  ;;  %v1326_v30 = vpack.c.bf16 %v515_v28, %v514_v27  ;;  %v517_v35 = vld [vmem:[%s1938_s3 + $0x410] sm:$0xff] }
  0x1d   :  { %224 = vmatpush1.bf16.msra.mxu0 %v1425_v25  ;;  %1315 = vmatpush1.bf16.msra.mxu1 %v1314_v43  ;;  %v1449_v25 = vld [vmem:[%s1941_s0 + $0x60] ss:$8 sps:$4 sm:$0xff]   ;;  %v799_v38 = vld [vmem:[%s1938_s3 + $0x2d0] sm:$0xff] }
  0x1e   :  { %225 = vmatprep.subr.bf16.mxu0 %v1454_v4  ;;  %1316 = vmatprep.subr.bf16.mxu1 %v1455_v18  ;;  %v516_v34 = vld [vmem:[%s1938_s3 + $0x400] sm:$0xff]  ;;  %v611_v53 = vld [vmem:[%s1938_s3 + $0x170] sm:$0xff] }
  0x1f   :  { %v1329_v37 = vpack.c.bf16 %v517_v35, %v516_v34  ;;  %v1157_v43 = vld [vmem:[%s1938_s3 + $0x520] ss:$8 sm:$0x3]  ;;  %v1769_v60 = vld [vmem:[%s1938_s3 + $0x10] sm:$0xff] }
  0x20   :  { %v610_v52 = vld [vmem:[%s1938_s3 + $0x160] sm:$0xff] }
  0x21   :  { %226 = vmatpush1.bf16.msra.mxu0 %v1426_v32  ;;  %1318 = vmatpush1.bf16.msra.mxu1 %v1317_v51  ;;  %v1386_v32 = vpack.c.bf16 %v797_v31, %v796_v29  ;;  %v1332_v56 = vpack.c.bf16 %v611_v53, %v610_v52 }
  0x22   :  { %227 = vmatprep.subr.bf16.mxu0 %v1454_v4  ;;  %1319 = vmatprep.subr.bf16.mxu1 %v1455_v18 }
  0x25   :  { %228 = vmatpush1.bf16.msra.mxu0 %v1427_v36  ;;  %1321 = vmatpush1.bf16.msra.mxu1 %v1320_v57  ;;  %v798_v36 = vld [vmem:[%s1938_s3 + $0x2c0] sm:$0xff] }
  0x26   :  { %229 = vmatprep.subr.bf16.mxu0 %v1454_v4  ;;  %1322 = vmatprep.subr.bf16.mxu1 %v1455_v18  ;;  %v788_v4 = vld [vmem:[%s1938_s3 + $0x220] sm:$0xff]  ;;  %v1389_v39 = vpack.c.bf16 %v799_v38, %v798_v36 }
  0x27   :  { %v1374_v8 = vpack.c.bf16 %v789_v5, %v788_v4 }
  0x29   :  { %230 = vmatpush1.bf16.msra.mxu0 %v1428_v40  ;;  %1324 = vmatpush1.bf16.msra.mxu1 %v1323_v1  ;;  %v410_v40 = vlaneseq }
  0x2a   :  { %1361 = vmatprep.subr.bf16.mxu0 %v1455_v18  ;;  %1325 = vmatprep.subr.bf16.mxu1 %v1455_v18 }
  0x2b   :  { %v411_v41 = vshrl.u32 %v410_v40, 7 }
  0x2c   :  { %244 = vmatmul.mubr.bf16.vlgmr.msra.gmra.mrb[0].mxu0 %v1429_v44 }
  0x2d   :  { %1150 = vmatprep.mubr.msk.bf16.mxu0 %vm186_vm0, %v1432_v47  ;;  %1363 = vmatpush1.bf16.msra.mxu0 %v1362_v48  ;;  %v412_v42 = vsub.s32 0, %v411_v41  ;;  %v416_v44 = vsub.s32 1, %v411_v41 }
  0x2e   :  { %1364 = vmatprep.subr.bf16.mxu0 %v1455_v18  ;;  %1327 = vmatpush1.bf16.msra.mxu1 %v1326_v30 }
  0x2f   :  { %1328 = vmatprep.subr.bf16.mxu1 %v1455_v18  ;;  %v413_v45 = vrot.slane %v1157_v43, %v412_v42  ;;  %v417_v46 = vrot.slane %v1157_v43, %v416_v44 }
  0x31   :  { %1366 = vmatpush1.bf16.msra.mxu0 %v1365_v54 }
  0x32   :  { %1367 = vmatprep.subr.bf16.mxu0 %v1455_v18  ;;  %1330 = vmatpush1.bf16.msra.mxu1 %v1329_v37 }
  0x33   :  { %1331 = vmatprep.subr.bf16.mxu1 %v1455_v18 }
  0x34   :  { %252 = vmatmul.mubr.bf16.gmra.mrb[4].mxu0 %v1434_v58  ;;  %v1764_v58 = vld [vmem:[%s1938_s3] sm:$0xff] }
  0x35   :  { %1151 = vmatprep.mubr.msk.bf16.mxu0 %vm186_vm0, %v1435_v61  ;;  %1369 = vmatpush1.bf16.msra.mxu0 %v1368_v62 }
  0x36   :  { %1370 = vmatprep.subr.bf16.mxu0 %v1455_v18 }
  0x39   :  { %1372 = vmatpush1.bf16.msra.mxu0 %v1371_v2 }
  0x3a   :  { %1373 = vmatprep.subr.bf16.mxu0 %v1455_v18 }
  0x3c   :  { %260 = vmatmul.mubr.bf16.gmra.mrb[8].mxu0 %v1437_v6 }
  0x3d   :  { %1152 = vmatprep.mubr.msk.bf16.mxu0 %vm186_vm0, %v1438_v7  ;;  %1375 = vmatpush1.bf16.msra.mxu0 %v1374_v8 }
  0x3e   :  { %1376 = vmatprep.subr.bf16.mxu0 %v1455_v18 }
  0x41   :  { %1378 = vmatpush1.bf16.msra.mxu0 %v1377_v11 }
  0x42   :  { %1379 = vmatprep.subr.bf16.mxu0 %v1455_v18 }
  0x44   :  { %268 = vmatmul.mubr.bf16.gmra.mrb[12].mxu0 %v1440_v14 }
  0x45   :  { %1153 = vmatprep.mubr.msk.bf16.mxu0 %vm186_vm0, %v1441_v15  ;;  %1381 = vmatpush1.bf16.msra.mxu0 %v1380_v16 }
  0x46   :  { %1382 = vmatprep.subr.bf16.mxu0 %v1455_v18 }
  0x49   :  { %1384 = vmatpush1.bf16.msra.mxu0 %v1383_v20 }
  0x4a   :  { %1385 = vmatprep.subr.bf16.mxu0 %v1455_v18 }
  0x4c   :  { %276 = vmatmul.mubr.bf16.gmra.mrb[16].mxu0 %v1443_v21 }
  0x4d   :  { %1154 = vmatprep.mubr.msk.bf16.mxu0 %vm186_vm0, %v1444_v22  ;;  %1387 = vmatpush1.bf16.msra.mxu0 %v1386_v32 }
  0x4e   :  { %1388 = vmatprep.subr.bf16.mxu0 %v1455_v18 }
  0x51   :  { %1390 = vmatpush1.bf16.msra.mxu0 %v1389_v39 }
  0x52   :  { %1403 = vmatprep.subr.bf16.mxu0 %v1455_v18 }
  0x54   :  { %284 = vmatmul.mubr.bf16.gmra.mrb[20].mxu0 %v1446_v23 }
  0x55   :  { %1155 = vmatprep.mubr.msk.bf16.mxu0 %vm186_vm0, %v1447_v24 }
  0x5c   :  { %292 = vmatmul.mubr.bf16.gmra.mrb[24].mxu0 %v1449_v25 }
  0x5d   :  { %1156 = vmatprep.mubr.msk.bf16.mxu0 %vm186_vm0, %v1450_v26 }
  0x64   :  { %300 = vmatmul.mubr.bf16.gmra.mrb[28].mxu0 %v1452_v33 }
  0xdf   :  { %v489_v47 = vpop.f32.mrb[0].mxu1 }
  0xe0   :  { %v490_v48 = vadd.f32 %v489_v47, %v413_v45  ;;  %v491_v49 = vpop.f32.mrb[1].mxu1 }
  0xe1   :  { %v492_v50 = vadd.f32 %v491_v49, %v417_v46 }
  0xe2   :  { %v494_v51 = vmul.f32 0.1, %v490_v48 }
  0xe3   :  { %v495_v54 = vmul.f32 0.1, %v492_v50 }
  0xe4   :  { %v496_v57 = vmax.f32 %v490_v48, %v494_v51 }
  0xe5   :  { %v497_v55 = vmax.f32 %v492_v50, %v495_v54 }
  0xe7   :  { %1159 = vmatprep.mubr.msk.f32.mxu1 %vm186_vm0, %v497_v55  ;;  %1161 = vmatprep.mubr.msk.f32.mxu0 %vm186_vm0, %v497_v55 }
  0xe8   :  { %587 = vmatmul.mubr.f32.vlgmr.msra.gmra.mrb[2].mxu1 %v496_v57  ;;  %865 = vmatmul.mubr.f32.vlgmr.msra.gmra.mrb[32].mxu0 %v496_v57 }
  0xe9   :  { %1333 = vmatpush3.bf16.msra.mxu1 %v1332_v56  ;;  %1214 = vmatprep.mubr.msk.f32.mxu1 %vm1456_vm6, %v1453_v3 }
  0xea   :  { %1334 = vmatprep.subr.bf16.mxu1 %v1455_v18  ;;  %1279 = vmatprep.mubr.msk.f32.mxu0 %vm1456_vm6, %v1453_v3 }
  0xff   :  { %v245_v59 = vpop.f32.mrb[0].mxu0 }
 0x100   :  { %v310_v61 = vadd.f32 %v1764_v58, %v245_v59  ;;  %v247_v62 = vpop.f32.mrb[1].mxu0 }
 0x101   :  { %v248_v63 = vpop.f32.mrb[2].mxu0 }
 0x102   :  { %v326_v0 = vmax.f32 %v310_v61, 0.0  ;;  %v311_v1 = vadd.f32 %v1769_v60, %v248_v63  ;;  %v250_v2 = vpop.f32.mrb[3].mxu0 }
 0x104   :  { %v327_v4 = vmax.f32 %v311_v1, 0.0 }
 0x106   :  { %v342_v5 = vmax.f32 %v326_v0, %v327_v4 }
 0x107   :  { %v253_v6 = vpop.f32.mrb[4].mxu0 }
 0x108   :  { %v343_v7 = vrot.slane %v342_v5, 4  ;;  %v312_v8 = vadd.f32 %v1764_v58, %v253_v6  ;;  %v255_v9 = vpop.f32.mrb[5].mxu0 }
 0x109   :  { %v256_v10 = vpop.f32.mrb[6].mxu0 }
 0x10a   :  { %v344_v11 = vmax.f32 %v342_v5, %v343_v7  ;;  %v328_v12 = vmax.f32 %v312_v8, 0.0  ;;  %v313_v13 = vadd.f32 %v1769_v60, %v256_v10  ;;  %v258_v14 = vpop.f32.mrb[7].mxu0 }
 0x10c   :  { %v345_v15 = vrot.slane %v344_v11, 2  ;;  %v329_v16 = vmax.f32 %v313_v13, 0.0 }
 0x10e   :  { %v349_v17 = vmax.f32 %v328_v12, %v329_v16  ;;  %v346_v20 = vmax.f32 %v344_v11, %v345_v15 }
 0x10f   :  { %v261_v19 = vpop.f32.mrb[8].mxu0 }
 0x110   :  { %v350_v21 = vrot.slane %v349_v17, 4  ;;  %v314_v22 = vadd.f32 %v1764_v58, %v261_v19  ;;  %v263_v23 = vpop.f32.mrb[9].mxu0  ;;  %v347_v29 = vrot.slane %v346_v20, 1 }
 0x111   :  { %v264_v24 = vpop.f32.mrb[10].mxu0 }
 0x112   :  { %v351_v25 = vmax.f32 %v349_v17, %v350_v21  ;;  %v330_v26 = vmax.f32 %v314_v22, 0.0  ;;  %v315_v27 = vadd.f32 %v1769_v60, %v264_v24  ;;  %v266_v28 = vpop.f32.mrb[11].mxu0  ;;  %v348_v35 = vmax.f32 %v346_v20, %v347_v29 }
 0x114   :  { %v352_v30 = vrot.slane %v351_v25, 2  ;;  %v331_v31 = vmax.f32 %v315_v27, 0.0 }
 0x116   :  { %v353_v32 = vmax.f32 %v351_v25, %v352_v30  ;;  %v356_v33 = vmax.f32 %v330_v26, %v331_v31 }
 0x117   :  { %v269_v34 = vpop.f32.mrb[12].mxu0 }
 0x118   :  { %v354_v36 = vrot.slane %v353_v32, 1  ;;  %v357_v37 = vrot.slane %v356_v33, 4  ;;  %v316_v38 = vadd.f32 %v1764_v58, %v269_v34  ;;  %v271_v39 = vpop.f32.mrb[13].mxu0 }
 0x119   :  { %v272_v40 = vpop.f32.mrb[14].mxu0 }
 0x11a   :  { %v355_v41 = vmax.f32 %v353_v32, %v354_v36  ;;  %v358_v42 = vmax.f32 %v356_v33, %v357_v37  ;;  %v332_v43 = vmax.f32 %v316_v38, 0.0  ;;  %v317_v44 = vadd.f32 %v1769_v60, %v272_v40  ;;  %v274_v45 = vpop.f32.mrb[15].mxu0 }
 0x11c   :  { %v696_v46 = vsel %vm695_vm1, %v355_v41, %v348_v35  ;;  %v359_v47 = vrot.slane %v358_v42, 2  ;;  %v333_v48 = vmax.f32 %v317_v44, 0.0 }
 0x11e   :  { %v360_v49 = vmax.f32 %v358_v42, %v359_v47  ;;  %v363_v50 = vmax.f32 %v332_v43, %v333_v48 }
 0x11f   :  { %v277_v51 = vpop.f32.mrb[16].mxu0 }
 0x120   :  { %v361_v52 = vrot.slane %v360_v49, 1  ;;  %v364_v53 = vrot.slane %v363_v50, 4  ;;  %v318_v54 = vadd.f32 %v1764_v58, %v277_v51  ;;  %v279_v55 = vpop.f32.mrb[17].mxu0  ;;  %v613_v51 = vld [vmem:[%s1938_s3 + $0x190] sm:$0xff] }
 0x121   :  { %v280_v56 = vpop.f32.mrb[18].mxu0 }
 0x122   :  { %v362_v57 = vmax.f32 %v360_v49, %v361_v52  ;;  %v365_v59 = vmax.f32 %v363_v50, %v364_v53  ;;  %v334_v61 = vmax.f32 %v318_v54, 0.0  ;;  %v319_v62 = vadd.f32 %v1769_v60, %v280_v56  ;;  %v282_v63 = vpop.f32.mrb[19].mxu0  ;;  %v612_v50 = vld [vmem:[%s1938_s3 + $0x180] sm:$0xff] }
 0x123   :  { %v1335_v52 = vpack.c.bf16 %v613_v51, %v612_v50 }
 0x124   :  { %v698_v0 = vsel %vm697_vm2, %v362_v57, %v696_v46  ;;  %v366_v1 = vrot.slane %v365_v59, 2  ;;  %v335_v2 = vmax.f32 %v319_v62, 0.0 }
 0x125   :  { %1336 = vmatpush3.bf16.msra.mxu1 %v1335_v52 }
 0x126   :  { %v367_v4 = vmax.f32 %v365_v59, %v366_v1  ;;  %v370_v5 = vmax.f32 %v334_v61, %v335_v2  ;;  %1337 = vmatprep.subr.bf16.mxu1 %v1455_v18 }
 0x127   :  { %v285_v6 = vpop.f32.mrb[20].mxu0 }
 0x128   :  { %v368_v7 = vrot.slane %v367_v4, 1  ;;  %v371_v8 = vrot.slane %v370_v5, 4  ;;  %v320_v9 = vadd.f32 %v1764_v58, %v285_v6  ;;  %v287_v10 = vpop.f32.mrb[21].mxu0 }
 0x129   :  { %v288_v11 = vpop.f32.mrb[22].mxu0 }
 0x12a   :  { %v369_v12 = vmax.f32 %v367_v4, %v368_v7  ;;  %v372_v13 = vmax.f32 %v370_v5, %v371_v8  ;;  %v336_v14 = vmax.f32 %v320_v9, 0.0  ;;  %v321_v15 = vadd.f32 %v1769_v60, %v288_v11  ;;  %v290_v16 = vpop.f32.mrb[23].mxu0  ;;  %v518_v5 = vld [vmem:[%s1938_s3 + $0x521] ss:$0 sm:$0xff] }
 0x12b   :  { %v594_v11 = vld [vmem:[%s1938_s3 + $0x60] sm:$0xff] }
 0x12c   :  { %v373_v17 = vrot.slane %v372_v13, 2  ;;  %v337_v19 = vmax.f32 %v321_v15, 0.0  ;;  %v700_v20 = vsel %vm699_vm3, %v369_v12, %v698_v0  ;;  %v595_v12 = vld [vmem:[%s1938_s3 + $0x70] sm:$0xff]  ;;  %v596_v16 = vld [vmem:[%s1938_s3 + $0x80] sm:$0xff] }
 0x12e   :  { %v374_v21 = vmax.f32 %v372_v13, %v373_v17  ;;  %v377_v22 = vmax.f32 %v336_v14, %v337_v19  ;;  %v1338_v14 = vpack.c.bf16 %v595_v12, %v594_v11  ;;  %v597_v17 = vld [vmem:[%s1938_s3 + $0x90] sm:$0xff]  ;;  %v1042_v11 = vld [vmem:[%s1938_s3 + $0x500] sm:$0xff] }
 0x12f   :  { %v293_v23 = vpop.f32.mrb[24].mxu0  ;;  %v1341_v19 = vpack.c.bf16 %v597_v17, %v596_v16  ;;  %v1043_v12 = vld [vmem:[%s1938_s3 + $0x510] sm:$0xff] }
 0x130   :  { %v375_v24 = vrot.slane %v374_v21, 1  ;;  %v378_v25 = vrot.slane %v377_v22, 4  ;;  %v322_v26 = vadd.f32 %v1764_v58, %v293_v23  ;;  %v295_v27 = vpop.f32.mrb[25].mxu0  ;;  %v600_v23 = vld [vmem:[%s1938_s3 + $0xc0] sm:$0xff] }
 0x131   :  { %v296_v28 = vpop.f32.mrb[26].mxu0  ;;  %v603_v27 = vld [vmem:[%s1938_s3 + $0xf0] sm:$0xff] }
 0x132   :  { %v376_v29 = vmax.f32 %v374_v21, %v375_v24  ;;  %v379_v30 = vmax.f32 %v377_v22, %v378_v25  ;;  %v338_v31 = vmax.f32 %v322_v26, 0.0  ;;  %v323_v32 = vadd.f32 %v1769_v60, %v296_v28  ;;  %v298_v33 = vpop.f32.mrb[27].mxu0  ;;  %v599_v21 = vld [vmem:[%s1938_s3 + $0xb0] sm:$0xff]  ;;  %v602_v26 = vld [vmem:[%s1938_s3 + $0xe0] sm:$0xff] }
 0x133   :  { %v601_v24 = vld [vmem:[%s1938_s3 + $0xd0] sm:$0xff]  ;;  %v1350_v28 = vpack.c.bf16 %v603_v27, %v602_v26 }
 0x134   :  { %v380_v34 = vrot.slane %v379_v30, 2  ;;  %v339_v35 = vmax.f32 %v323_v32, 0.0  ;;  %v702_v36 = vsel %vm701_vm4, %v376_v29, %v700_v20  ;;  %v598_v20 = vld [vmem:[%s1938_s3 + $0xa0] sm:$0xff]  ;;  %v1347_v25 = vpack.c.bf16 %v601_v24, %v600_v23  ;;  %v607_v33 = vld [vmem:[%s1938_s3 + $0x130] sm:$0xff] }
 0x135   :  { %v1344_v22 = vpack.c.bf16 %v599_v21, %v598_v20  ;;  %v604_v29 = vld [vmem:[%s1938_s3 + $0x100] sm:$0xff] }
 0x136   :  { %v381_v37 = vmax.f32 %v379_v30, %v380_v34  ;;  %v384_v38 = vmax.f32 %v338_v31, %v339_v35  ;;  %v605_v30 = vld [vmem:[%s1938_s3 + $0x110] sm:$0xff]  ;;  %v606_v32 = vld [vmem:[%s1938_s3 + $0x120] sm:$0xff] }
 0x137   :  { %v301_v39 = vpop.f32.mrb[28].mxu0  ;;  %v1353_v31 = vpack.c.bf16 %v605_v30, %v604_v29  ;;  %v1356_v34 = vpack.c.bf16 %v607_v33, %v606_v32  ;;  %v608_v35 = vld [vmem:[%s1938_s3 + $0x140] sm:$0xff] }
 0x138   :  { %v382_v40 = vrot.slane %v381_v37, 1  ;;  %v385_v41 = vrot.slane %v384_v38, 4  ;;  %v324_v42 = vadd.f32 %v1764_v58, %v301_v39  ;;  %v303_v43 = vpop.f32.mrb[29].mxu0  ;;  %v876_v39 = vld [vmem:[%s1938_s3 + $0x430] sm:$0xff] }
 0x139   :  { %v304_v44 = vpop.f32.mrb[30].mxu0 }
 0x13a   :  { %v383_v45 = vmax.f32 %v381_v37, %v382_v40  ;;  %v386_v46 = vmax.f32 %v384_v38, %v385_v41  ;;  %v340_v47 = vmax.f32 %v324_v42, 0.0  ;;  %v325_v48 = vadd.f32 %v1769_v60, %v304_v44  ;;  %v306_v49 = vpop.f32.mrb[31].mxu0  ;;  %v875_v38 = vld [vmem:[%s1938_s3 + $0x420] sm:$0xff]  ;;  %v878_v42 = vld [vmem:[%s1938_s3 + $0x450] sm:$0xff] }
 0x13b   :  { %v1392_v40 = vpack.c.bf16 %v876_v39, %v875_v38  ;;  %v877_v41 = vld [vmem:[%s1938_s3 + $0x440] sm:$0xff] }
 0x13c   :  { %v387_v53 = vrot.slane %v386_v46, 2  ;;  %v341_v58 = vmax.f32 %v325_v48, 0.0  ;;  %v704_v54 = vsel %vm703_vm5, %v383_v45, %v702_v36  ;;  %v609_v36 = vld [vmem:[%s1938_s3 + $0x150] sm:$0xff]  ;;  %v1395_v43 = vpack.c.bf16 %v878_v42, %v877_v41  ;;  %v879_v44 = vld [vmem:[%s1938_s3 + $0x460] sm:$0xff] }
 0x13d   :  { %v1359_v37 = vpack.c.bf16 %v609_v36, %v608_v35  ;;  %v880_v45 = vld [vmem:[%s1938_s3 + $0x470] sm:$0xff] }
 0x13e   :  { %v388_v55 = vmax.f32 %v386_v46, %v387_v53  ;;  %v391_v56 = vmax.f32 %v340_v47, %v341_v58  ;;  %v1398_v46 = vpack.c.bf16 %v880_v45, %v879_v44  ;;  %v881_v47 = vld [vmem:[%s1938_s3 + $0x480] sm:$0xff]  ;;  %v882_v48 = vld [vmem:[%s1938_s3 + $0x490] sm:$0xff] }
 0x13f   :  { %v1401_v49 = vpack.c.bf16 %v882_v48, %v881_v47 }
 0x140   :  { %v389_v57 = vrot.slane %v388_v55, 1  ;;  %v392_v60 = vrot.slane %v391_v56, 4 }
 0x142   :  { %v390_v59 = vmax.f32 %v388_v55, %v389_v57  ;;  %v393_v61 = vmax.f32 %v391_v56, %v392_v60 }
 0x144   :  { %v394_v62 = vrot.slane %v393_v61, 2  ;;  %v706_v63 = vsel %vm705_vm7, %v390_v59, %v704_v54  ;;  %v871_v54 = vld [vmem:[%s1938_s3 + $0x522] ss:$0 sm:$0xff] }
 0x145   :  { %v960_v59 = vld [vmem:[%s1938_s3 + $0x4a0] sm:$0xff] }
 0x146   :  { %v395_v0 = vmax.f32 %v393_v61, %v394_v62  ;;  %v961_v61 = vld [vmem:[%s1938_s3 + $0x4b0] sm:$0xff] }
 0x147   :  { %v1404_v62 = vpack.c.bf16 %v961_v61, %v960_v59 }
 0x148   :  { %v396_v1 = vrot.slane %v395_v0, 1 }
 0x149   :  { %1405 = vmatpush3.bf16.msra.mxu0 %v1404_v62 }
 0x14a   :  { %v397_v2 = vmax.f32 %v395_v0, %v396_v1  ;;  %1406 = vmatprep.subr.bf16.mxu0 %v1455_v18  ;;  %v883_v1 = vld [vmem:[%s1938_s3 + $0x523] ss:$0 sm:$0xff] }
 0x14c   :  { %v708_v4 = vsel %vm707_vm8, %v397_v2, %v706_v63  ;;  %v962_v63 = vld [vmem:[%s1938_s3 + $0x4c0] sm:$0xff] }
 0x1bb   :  { %v588_v6 = vpop.f32.mrb[2].mxu1  ;;  %v1801_v7 = vpop.f32.mrb[32].mxu0 }
 0x1bc   :  { %v589_v8 = vadd.f32 %v588_v6, %v518_v5  ;;  %v590_v9 = vpop.f32.mrb[3].mxu1  ;;  %v868_v10 = vpop.f32.mrb[33].mxu0 }
 0x1bd   :  { %v1041_v9 = vld [vmem:[%s1938_s3 + $0x4f0] sm:$0xff] }
 0x1be   :  { %v592_v13 = vmul.f32 0.1, %v589_v8 }
 0x1c0   :  { %v593_v15 = vmax.f32 %v589_v8, %v592_v13  ;;  %v1040_v8 = vld [vmem:[%s1938_s3 + $0x4e0] sm:$0xff]  ;;  %v1413_v13 = vpack.c.bf16 %v1043_v12, %v1042_v11 }
 0x1c1   :  { %v1410_v10 = vpack.c.bf16 %v1041_v9, %v1040_v8 }
 0x1c2   :  { %1215 = vmatmul.mubr.msk.f32.vlgmr.msra.gmra.mrb[4].mxu1 %vm186_vm0, %v593_v15 }
 0x1c3   :  { %1339 = vmatpush3.bf16.msra.mxu1 %v1338_v14  ;;  %1249 = vmatprep.mubr.msk.f32.mxu1 %vm1456_vm6, %v1453_v3  ;;  %v964_v14 = vld [vmem:[%s1938_s3 + $0x524] ss:$0 sm:$0xff] }
 0x1c4   :  { %1340 = vmatprep.subr.bf16.mxu1 %v1455_v18 }
 0x1c7   :  { %1342 = vmatpush3.bf16.msra.mxu1 %v1341_v19 }
 0x1c8   :  { %1343 = vmatprep.subr.bf16.mxu1 %v1455_v18 }
 0x1cb   :  { %1345 = vmatpush3.bf16.msra.mxu1 %v1344_v22 }
 0x1cc   :  { %1346 = vmatprep.subr.bf16.mxu1 %v1455_v18 }
 0x1cf   :  { %1348 = vmatpush3.bf16.msra.mxu1 %v1347_v25 }
 0x1d0   :  { %1349 = vmatprep.subr.bf16.mxu1 %v1455_v18 }
 0x1d3   :  { %1351 = vmatpush3.bf16.msra.mxu1 %v1350_v28 }
 0x1d4   :  { %1352 = vmatprep.subr.bf16.mxu1 %v1455_v18 }
 0x1d7   :  { %1354 = vmatpush3.bf16.msra.mxu1 %v1353_v31 }
 0x1d8   :  { %1355 = vmatprep.subr.bf16.mxu1 %v1455_v18 }
 0x1db   :  { %1357 = vmatpush3.bf16.msra.mxu1 %v1356_v34 }
 0x1dc   :  { %1358 = vmatprep.subr.bf16.mxu1 %v1455_v18 }
 0x1df   :  { %1360 = vmatpush3.bf16.msra.mxu1 %v1359_v37 }
 0x1e0   :  { %1391 = vmatprep.subr.bf16.mxu1 %v1455_v18 }
 0x1e2   :  { %1250 = vmatmul.mubr.f32.vlgmr.msra.gmra.mrb[6].mxu1 %v708_v4 }
 0x1e3   :  { %1268 = vmatprep.mubr.msk.f32.mxu1 %vm1456_vm6, %v1453_v3  ;;  %1393 = vmatpush3.bf16.msra.mxu1 %v1392_v40 }
 0x1e4   :  { %1394 = vmatprep.subr.bf16.mxu1 %v1455_v18 }
 0x1e7   :  { %1396 = vmatpush3.bf16.msra.mxu1 %v1395_v43 }
 0x1e8   :  { %1397 = vmatprep.subr.bf16.mxu1 %v1455_v18 }
 0x1eb   :  { %1399 = vmatpush3.bf16.msra.mxu1 %v1398_v46 }
 0x1ec   :  { %1400 = vmatprep.subr.bf16.mxu1 %v1455_v18 }
 0x1ef   :  { %1402 = vmatpush3.bf16.msra.mxu1 %v1401_v49 }
 0x1f0   :  { %1409 = vmatprep.subr.bf16.mxu1 %v1455_v18 }
 0x295   :  { %v683_v50 = vpop.f32.mrb[4].mxu1 }
 0x296   :  { %v1216_v51 = vpop.f32.mrb[5].mxu1 }
 0x2b5   :  { %v776_v52 = vpop.f32.mrb[6].mxu1 }
 0x2b6   :  { %v777_v53 = vadd.f32 %v776_v52, %v683_v50  ;;  %v1251_v58 = vpop.f32.mrb[7].mxu1 }
 0x2b8   :  { %v870_v55 = vadd.f32 %v1801_v7, %v777_v53 }
 0x2ba   :  { %v872_v56 = vadd.f32 %v871_v54, %v870_v55 }
 0x2bc   :  { %v873_v57 = vmul.f32 0.1, %v872_v56 }
 0x2be   :  { %v874_v60 = vmax.f32 %v872_v56, %v873_v57 }
 0x2c0   :  { %1269 = vmatmul.mubr.msk.f32.vlgmr.msra.gmra.mrb[8].mxu1 %vm884_vm9, %v874_v60 }
 0x2c1   :  { %1290 = vmatprep.mubr.msk.f32.mxu1 %vm1456_vm6, %v1453_v3  ;;  %v963_v3 = vld [vmem:[%s1938_s3 + $0x4d0] sm:$0xff]  ;;  %1411 = vmatpush3.bf16.msra.mxu1 %v1410_v10 }
 0x2c2   :  { %v1407_v0 = vpack.c.bf16 %v963_v3, %v962_v63  ;;  %1412 = vmatprep.subr.bf16.mxu1 %v1455_v18  ;;  %v1044_v18 = vld [vmem:[%s1938_s3 + $0x525] ss:$0 sm:$0xff] }
 0x2c4   :  { %1408 = vmatpush3.bf16.msra.mxu0 %v1407_v0 }
 0x2c5   :  { %1414 = vmatpush3.bf16.msra.mxu1 %v1413_v13 }
 0x393   :  { %v954_v2 = vpop.f32.mrb[8].mxu1 }
 0x394   :  { %v955_v4 = vadd.f32 %v954_v2, %v883_v1  ;;  %v1270_v5 = vpop.f32.mrb[9].mxu1 }
 0x396   :  { %v958_v6 = vmul.f32 0.1, %v955_v4 }
 0x398   :  { %v959_v7 = vmax.f32 %v955_v4, %v958_v6 }
 0x39a   :  { %1280 = vmatmul.mubr.msk.f32.vlgmr.msra.gmra.mrb[34].mxu0 %vm186_vm0, %v959_v7 }
 0x46d   :  { %v1034_v15 = vpop.f32.mrb[34].mxu0 }
 0x46e   :  { %v1035_v16 = vadd.f32 %v1034_v15, %v964_v14  ;;  %v1281_v17 = vpop.f32.mrb[35].mxu0 }
 0x470   :  { %v1038_v19 = vmul.f32 0.1, %v1035_v16 }
 0x472   :  { %v1039_v20 = vmax.f32 %v1035_v16, %v1038_v19 }
 0x474   :  { %1291 = vmatmul.mubr.msk.f32.vlgmr.msra.gmra.mrb[10].mxu1 %vm186_vm0, %v1039_v20 }
 0x547   :  { %v1114_v21 = vpop.f32.mrb[10].mxu1 }
 0x548   :  { %v1115_v22 = vadd.f32 %v1114_v21, %v1044_v18  ;;  %v1292_v23 = vpop.f32.mrb[11].mxu1 }
 0x54a   :  { %1118 = vst [vmem:[%s1942_s4] sm:$0xff] %v1115_v22 }

</bundles_post_ra>
